<compile_context>
chip_gen: v7x
topology: tpu7x:2x2x1
jax: 0.10.0
libtpu: 0.0.40
codegen_flags: <defaults>
</compile_context>

<pallas_src>
import functools
from typing import NamedTuple, Tuple

import jax
import jax.numpy as jnp
from jax.experimental import pallas as pl
from jax.experimental.pallas import tpu as pltpu


def _round_up(x, m):
    return (x + m - 1) // m * m


def _sublane(dtype):
    # Rows per packed (sublane, 128) vreg tile: 8 for f32, 16 for bf16, 32 for i8/fp8.
    return 8 * 4 // jnp.dtype(dtype).itemsize


class PackedParams(NamedTuple):
    w_packed: jax.Array                       # (sum_i in_pad_i, max_i out_pad_i)
    b_packed: jax.Array                       # (round_up(n_layers, sublane), max_i out_pad_i)
    layer_dims: Tuple[Tuple[int, int], ...]   # static padded (in_pad, out_pad) per layer
    row_offsets: Tuple[int, ...]              # static row offset of each layer in w_packed
    in_dim: int
    num_classes: int


def pack_neural_network_params(trunk_params, cls_params, bbox_params, *,
                               param_dtype=jnp.bfloat16):
    """One-time packing of all parameters (call at model init, not per forward).

    trunk_params : list of (W[fan_in, fan_out], b[fan_out]) shared trunk layers.
    cls_params   : (W[hidden, num_classes], b[num_classes])
    bbox_params  : (W[hidden, 4], b[4])
    The two heads are fused into one (hidden, num_classes+4) layer; each layer
    is zero-padded to its own 128-lane-aligned shape and stacked row-wise.
    """
    dtype = jnp.dtype(param_dtype)
    num_classes = cls_params[0].shape[1]

    head_w = jnp.concatenate([cls_params[0], bbox_params[0]], axis=1)
    head_b = jnp.concatenate([cls_params[1], bbox_params[1]], axis=0)
    layers = list(trunk_params) + [(head_w, head_b)]

    dims = [(w.shape[0], w.shape[1]) for w, _ in layers]
    for i in range(len(dims) - 1):                       # widths must chain
        assert dims[i][1] == dims[i + 1][0]
    layer_dims = tuple((_round_up(fi, 128), _round_up(fo, 128)) for fi, fo in dims)

    row_offsets, off = [], 0
    for in_pad, _ in layer_dims:
        row_offsets.append(off)
        off += in_pad
    w_rows = off
    w_cols = max(o for _, o in layer_dims)

    w_packed = jnp.zeros((w_rows, w_cols), dtype)
    b_packed = jnp.zeros((_round_up(len(layers), max(8, _sublane(dtype))), w_cols), dtype)
    for i, (w, b) in enumerate(layers):
        r = row_offsets[i]
        w_packed = w_packed.at[r:r + w.shape[0], :w.shape[1]].set(w.astype(dtype))
        b_packed = b_packed.at[i, :b.shape[0]].set(b.astype(dtype))

    return PackedParams(w_packed=w_packed, b_packed=b_packed,
                        layer_dims=layer_dims, row_offsets=tuple(row_offsets),
                        in_dim=dims[0][0], num_classes=num_classes)


def _fused_mlp_kernel(x_ref, w_ref, b_ref, out_ref, *, layer_dims, row_offsets):
    """One batch tile of the full shared-trunk + fused-head MLP.

    x_ref   : (tb, in_pad_0)        batch tile (zero padded)
    w_ref   : (sum in_pad, max out)  packed per-layer padded weights (resident)
    b_ref   : (rows, max out)        packed per-layer padded biases  (resident)
    out_ref : (tb, out_pad_head)     fused (cls || bbox) head output, f32

    Trunk layers get a ReLU; the final fused head does not. All matmuls
    accumulate in f32 on the MXU; bias-add / ReLU stay in f32 and activations
    are cast back to the storage dtype only to feed the next MXU pass.
    """
    n_layers = len(layer_dims)
    compute_dtype = x_ref.dtype
    h = x_ref[...]
    for i, (in_pad, out_pad) in enumerate(layer_dims):          # statically unrolled
        w = w_ref[pl.ds(row_offsets[i], in_pad), :out_pad]      # static slice, free
        b = b_ref[pl.ds(i, 1), :out_pad].astype(jnp.float32)
        acc = jnp.dot(h, w, preferred_element_type=jnp.float32) + b
        if i < n_layers - 1:
            h = jnp.maximum(acc, 0.0).astype(compute_dtype)     # trunk: ReLU
        else:
            out_ref[...] = acc.astype(out_ref.dtype)            # fused cls||bbox head


def neural_network_forward(x, packed: PackedParams, *, block_batch=256):
    """Steady-state forward: pads x, launches the kernel, splits logits/bbox."""
    batch, in_dim = x.shape
    assert in_dim == packed.in_dim
    compute_dtype = packed.w_packed.dtype
    itemsize = jnp.dtype(compute_dtype).itemsize
    sub = _sublane(compute_dtype)

    layer_dims = packed.layer_dims
    in_pad0 = layer_dims[0][0]
    out_pad_head = layer_dims[-1][1]

    # --- batch tile: sublane-aligned; >=2 grid steps when batch allows (so the
    #     "parallel" axis can shard across v7x's two TensorCores); capped so the
    #     per-step live intermediates stay well inside VMEM. ---
    batch_sub = _round_up(batch, sub)
    tb = max(sub, min(_round_up(block_batch, sub), batch_sub))
    if _round_up(batch, tb) // tb < 2 and batch_sub >= 2 * sub:
        tb = _round_up(-(-batch // 2), sub)
    max_width = max(max(i, o) for i, o in layer_dims)
    per_row = (max_width * (4 + itemsize)          # f32 acc + compute-dtype h
               + 2 * in_pad0 * itemsize            # double-buffered x tile
               + 2 * out_pad_head * 4)             # double-buffered f32 out tile
    while tb > sub and tb * per_row > 24 * 1024 * 1024:
        tb = max(sub, _round_up(tb // 2, sub))
    batch_pad = _round_up(batch, tb)
    grid = (batch_pad // tb,)

    x_pad = jnp.pad(x.astype(compute_dtype),
                    ((0, batch_pad - batch), (0, in_pad0 - in_dim)))

    kernel = functools.partial(_fused_mlp_kernel,
                               layer_dims=layer_dims,
                               row_offsets=packed.row_offsets)

    cost = pl.CostEstimate(
        flops=2 * batch_pad * sum(i * o for i, o in layer_dims),
        transcendentals=0,
        bytes_accessed=(x_pad.size * itemsize
                        + packed.w_packed.size * itemsize      # fetched once, resident
                        + packed.b_packed.size * itemsize
                        + batch_pad * out_pad_head * 4),
    )

    def run(single_buffer):
        resident_kwargs = {}
        if single_buffer:
            # Constant index_map -> double-buffering buys nothing; halve resident VMEM.
            resident_kwargs = dict(pipeline_mode=pl.Buffered(1))
        w_bufs = 1 if single_buffer else 2
        footprint = (w_bufs * (packed.w_packed.size + packed.b_packed.size) * itemsize
                     + tb * per_row)
        vmem_limit = int(min(64 * 1024 * 1024,                 # v7x physical ceiling
                             max(2 * footprint + (2 << 20),
                                 16 * 1024 * 1024)))           # v5e scoped default floor
        return pl.pallas_call(
            kernel,
            out_shape=jax.ShapeDtypeStruct((batch_pad, out_pad_head), jnp.float32),
            grid=grid,
            in_specs=[
                pl.BlockSpec((tb, in_pad0), lambda i: (i, 0)),               # x (pipelined)
                pl.BlockSpec(packed.w_packed.shape, lambda i: (0, 0),
                             **resident_kwargs),                             # weights (resident)
                pl.BlockSpec(packed.b_packed.shape, lambda i: (0, 0),
                             **resident_kwargs),                             # biases  (resident)
            ],
            out_specs=pl.BlockSpec((tb, out_pad_head), lambda i: (i, 0)),
            compiler_params=pltpu.CompilerParams(
                dimension_semantics=("parallel",),
                vmem_limit_bytes=vmem_limit),
            cost_estimate=cost,
        )(x_pad, packed.w_packed, packed.b_packed)

    try:
        out_pad = run(single_buffer=True)
    except Exception:
        # Fallback for jax versions that reject single-buffered resident specs.
        out_pad = run(single_buffer=False)

    logits = out_pad[:batch, :packed.num_classes]
    bbox = out_pad[:batch, packed.num_classes:packed.num_classes + 4]
    return logits, bbox


# ----------------------------------------------------------------------------
# Reference / test harness
# ----------------------------------------------------------------------------
def _init_linear(key, fan_in, fan_out, dtype=jnp.float32):
    """PyTorch nn.Linear default init (U(-k, k), k=1/sqrt(fan_in)); W is (fan_in, fan_out)."""
    kw, kb = jax.random.split(key)
    bound = 1.0 / (fan_in ** 0.5)
    w = jax.random.uniform(kw, (fan_in, fan_out), dtype, -bound, bound)
    b = jax.random.uniform(kb, (fan_out,), dtype, -bound, bound)
    return w, b


def _reference_forward(x, trunk_params, cls_params, bbox_params):
    """Plain-JAX reference with separate heads (validates the head fusion)."""
    h = x
    for w, b in trunk_params:
        h = jnp.maximum(h @ w + b, 0.0)
    logits = h @ cls_params[0] + cls_params[1]
    bbox = h @ bbox_params[0] + bbox_params[1]
    return logits, bbox


if __name__ == "__main__":
    # Module config: lengths defines the shared trunk, num_classes the cls head.
    lengths = [32, 64, 32]
    num_classes = 8
    batch = 64

    key = jax.random.PRNGKey(0)
    keys = jax.random.split(key, len(lengths) + 2)

    trunk_params = [_init_linear(keys[i], lengths[i], lengths[i + 1])
                    for i in range(len(lengths) - 1)]
    cls_params = _init_linear(keys[len(lengths) - 1], lengths[-1], num_classes)
    bbox_params = _init_linear(keys[len(lengths)], lengths[-1], 4)
    x = jax.random.normal(keys[-1], (batch, lengths[0]), jnp.float32)

    ref_logits, ref_bbox = _reference_forward(x, trunk_params, cls_params, bbox_params)

    # f32 packing: bit-faithful to the PyTorch module (tight tolerance).
    packed_f32 = pack_neural_network_params(trunk_params, cls_params, bbox_params,
                                            param_dtype=jnp.float32)
    logits, bbox = neural_network_forward(x, packed_f32)
    logits, bbox = jax.block_until_ready((logits, bbox))
    assert logits.shape == (batch, num_classes) and bbox.shape == (batch, 4)
    assert jnp.allclose(logits, ref_logits, atol=1e-5, rtol=1e-5)
    assert jnp.allclose(bbox, ref_bbox, atol=1e-5, rtol=1e-5)

    # Default packing (bf16 operands, f32 accumulation): v6e/v7x recommendation.
    # bf16 activation casts between layers grow error with trunk depth -> loose tol.
    packed_bf16 = pack_neural_network_params(trunk_params, cls_params, bbox_params)
    logits_bf, bbox_bf = neural_network_forward(x, packed_bf16)
    logits_bf, bbox_bf = jax.block_until_ready((logits_bf, bbox_bf))
    assert jnp.allclose(logits_bf, ref_logits, atol=1.5e-1, rtol=1e-1)
    assert jnp.allclose(bbox_bf, ref_bbox, atol=1.5e-1, rtol=1e-1)

    print("KERNEL_OK")
</pallas_src>

<mosaic_0001>
module attributes {stable_mosaic.version = 11 : i64} {
  func.func @_fused_mlp_kernel(%arg0: i32, %arg1: memref<32x128xf32, #tpu.memory_space<vmem>>, %arg2: memref<384x128xf32, #tpu.memory_space<vmem>>, %arg3: memref<8x128xf32, #tpu.memory_space<vmem>>, %arg4: memref<32x128xf32, #tpu.memory_space<vmem>>) attributes {dimension_semantics = [#tpu.dimension_semantics<parallel>], iteration_bounds = array<i64: 2>, scalar_prefetch = 0 : i64, scratch_operands = 0 : i64, tpu.core_type = #tpu.core_type<tc>, window_params = [{transform_indices = @transform_0, window_bounds = array<i64: 32, 128>}, {pipeline_mode = #tpu.pipeline_mode<synchronous>, transform_indices = @transform_1, window_bounds = array<i64: 384, 128>}, {pipeline_mode = #tpu.pipeline_mode<synchronous>, transform_indices = @transform_2, window_bounds = array<i64: 8, 128>}, {transform_indices = @transform_3, window_bounds = array<i64: 32, 128>}]} {
    %c0 = arith.constant 0 : index
    %c0_0 = arith.constant 0 : index
    %0 = vector.load %arg1[%c0, %c0_0] : memref<32x128xf32, #tpu.memory_space<vmem>>, vector<32x128xf32>
    %c0_1 = arith.constant 0 : index
    %c0_2 = arith.constant 0 : index
    %1 = vector.load %arg2[%c0_1, %c0_2] : memref<384x128xf32, #tpu.memory_space<vmem>>, vector<128x128xf32>
    %c0_3 = arith.constant 0 : index
    %c0_4 = arith.constant 0 : index
    %2 = vector.load %arg3[%c0_3, %c0_4] : memref<8x128xf32, #tpu.memory_space<vmem>>, vector<1x128xf32>
    %cst = arith.constant dense<0.000000e+00> : vector<32x128xf32>
    %3 = tpu.matmul %0, %1, %cst {dimension_numbers = #tpu.dot_dimension_numbers<[1], [0], [0], [1], [0, 0, 1, 1], [], []>} : vector<32x128xf32>, vector<128x128xf32>, vector<32x128xf32> -> vector<32x128xf32>
    %4 = vector.broadcast %2 : vector<1x128xf32> to vector<32x128xf32>
    %5 = arith.addf %3, %4 : vector<32x128xf32>
    %cst_5 = arith.constant 0.000000e+00 : f32
    %6 = vector.broadcast %cst_5 : f32 to vector<32x128xf32>
    %7 = arith.maximumf %5, %6 : vector<32x128xf32>
    %c128 = arith.constant 128 : index
    %c0_6 = arith.constant 0 : index
    %8 = vector.load %arg2[%c128, %c0_6] : memref<384x128xf32, #tpu.memory_space<vmem>>, vector<128x128xf32>
    %c1 = arith.constant 1 : index
    %c0_7 = arith.constant 0 : index
    %9 = vector.load %arg3[%c1, %c0_7] : memref<8x128xf32, #tpu.memory_space<vmem>>, vector<1x128xf32>
    %cst_8 = arith.constant dense<0.000000e+00> : vector<32x128xf32>
    %10 = tpu.matmul %7, %8, %cst_8 {dimension_numbers = #tpu.dot_dimension_numbers<[1], [0], [0], [1], [0, 0, 1, 1], [], []>} : vector<32x128xf32>, vector<128x128xf32>, vector<32x128xf32> -> vector<32x128xf32>
    %11 = vector.broadcast %9 : vector<1x128xf32> to vector<32x128xf32>
    %12 = arith.addf %10, %11 : vector<32x128xf32>
    %cst_9 = arith.constant 0.000000e+00 : f32
    %13 = vector.broadcast %cst_9 : f32 to vector<32x128xf32>
    %14 = arith.maximumf %12, %13 : vector<32x128xf32>
    %c256 = arith.constant 256 : index
    %c0_10 = arith.constant 0 : index
    %15 = vector.load %arg2[%c256, %c0_10] : memref<384x128xf32, #tpu.memory_space<vmem>>, vector<128x128xf32>
    %c2 = arith.constant 2 : index
    %c0_11 = arith.constant 0 : index
    %16 = vector.load %arg3[%c2, %c0_11] : memref<8x128xf32, #tpu.memory_space<vmem>>, vector<1x128xf32>
    %cst_12 = arith.constant dense<0.000000e+00> : vector<32x128xf32>
    %17 = tpu.matmul %14, %15, %cst_12 {dimension_numbers = #tpu.dot_dimension_numbers<[1], [0], [0], [1], [0, 0, 1, 1], [], []>} : vector<32x128xf32>, vector<128x128xf32>, vector<32x128xf32> -> vector<32x128xf32>
    %18 = vector.broadcast %16 : vector<1x128xf32> to vector<32x128xf32>
    %19 = arith.addf %17, %18 : vector<32x128xf32>
    %c0_13 = arith.constant 0 : index
    %c0_14 = arith.constant 0 : index
    %20 = vector.load %arg4[%c0_13, %c0_14] : memref<32x128xf32, #tpu.memory_space<vmem>>, vector<32x128xf32>
    tpu.vector_store %arg4[%c0_13, %c0_14], %19 {strides = array<i32>} : memref<32x128xf32, #tpu.memory_space<vmem>>, vector<32x128xf32>,
    return
  }
  func.func @transform_0(%arg0: i32) -> (i32, i32) {
    %c0_i32 = arith.constant 0 : i32
    %c0_i32_0 = arith.constant 0 : i32
    return %arg0, %c0_i32 : i32, i32
  }
  func.func @transform_1(%arg0: i32) -> (i32, i32) {
    %c0_i32 = arith.constant 0 : i32
    %c0_i32_0 = arith.constant 0 : i32
    %c0_i32_1 = arith.constant 0 : i32
    return %c0_i32, %c0_i32_0 : i32, i32
  }
  func.func @transform_2(%arg0: i32) -> (i32, i32) {
    %c0_i32 = arith.constant 0 : i32
    %c0_i32_0 = arith.constant 0 : i32
    %c0_i32_1 = arith.constant 0 : i32
    return %c0_i32, %c0_i32_0 : i32, i32
  }
  func.func @transform_3(%arg0: i32) -> (i32, i32) {
    %c0_i32 = arith.constant 0 : i32
    %c0_i32_0 = arith.constant 0 : i32
    return %arg0, %c0_i32 : i32, i32
  }
}

module attributes {stable_mosaic.version = 11 : i64} {
  func.func @_fused_mlp_kernel(%arg0: i32, %arg1: memref<32x128xf32, #tpu.memory_space<vmem>>, %arg2: memref<384x128xf32, #tpu.memory_space<vmem>>, %arg3: memref<8x128xf32, #tpu.memory_space<vmem>>, %arg4: memref<32x128xf32, #tpu.memory_space<vmem>>) attributes {dimension_semantics = [#tpu.dimension_semantics<parallel>], iteration_bounds = array<i64: 2>, scalar_prefetch = 0 : i64, scratch_operands = 0 : i64, tpu.core_type = #tpu.core_type<tc>, window_params = [{transform_indices = @transform_0, window_bounds = array<i64: 32, 128>}, {pipeline_mode = #tpu.pipeline_mode<synchronous>, transform_indices = @transform_1, window_bounds = array<i64: 384, 128>}, {pipeline_mode = #tpu.pipeline_mode<synchronous>, transform_indices = @transform_2, window_bounds = array<i64: 8, 128>}, {transform_indices = @transform_3, window_bounds = array<i64: 32, 128>}]} {
    %c0 = arith.constant 0 : index
    %c0_0 = arith.constant 0 : index
    %0 = vector.load %arg1[%c0, %c0_0] : memref<32x128xf32, #tpu.memory_space<vmem>>, vector<32x128xf32>
    %c0_1 = arith.constant 0 : index
    %c0_2 = arith.constant 0 : index
    %1 = vector.load %arg2[%c0_1, %c0_2] : memref<384x128xf32, #tpu.memory_space<vmem>>, vector<128x128xf32>
    %c0_3 = arith.constant 0 : index
    %c0_4 = arith.constant 0 : index
    %2 = vector.load %arg3[%c0_3, %c0_4] : memref<8x128xf32, #tpu.memory_space<vmem>>, vector<1x128xf32>
    %cst = arith.constant dense<0.000000e+00> : vector<32x128xf32>
    %3 = tpu.matmul %0, %1, %cst {dimension_numbers = #tpu.dot_dimension_numbers<[1], [0], [0], [1], [0, 0, 1, 1], [], []>} : vector<32x128xf32>, vector<128x128xf32>, vector<32x128xf32> -> vector<32x128xf32>
    %4 = vector.broadcast %2 : vector<1x128xf32> to vector<32x128xf32>
    %5 = arith.addf %3, %4 : vector<32x128xf32>
    %cst_5 = arith.constant 0.000000e+00 : f32
    %6 = vector.broadcast %cst_5 : f32 to vector<32x128xf32>
    %7 = arith.maximumf %5, %6 : vector<32x128xf32>
    %c128 = arith.constant 128 : index
    %c0_6 = arith.constant 0 : index
    %8 = vector.load %arg2[%c128, %c0_6] : memref<384x128xf32, #tpu.memory_space<vmem>>, vector<128x128xf32>
    %c1 = arith.constant 1 : index
    %c0_7 = arith.constant 0 : index
    %9 = vector.load %arg3[%c1, %c0_7] : memref<8x128xf32, #tpu.memory_space<vmem>>, vector<1x128xf32>
    %cst_8 = arith.constant dense<0.000000e+00> : vector<32x128xf32>
    %10 = tpu.matmul %7, %8, %cst_8 {dimension_numbers = #tpu.dot_dimension_numbers<[1], [0], [0], [1], [0, 0, 1, 1], [], []>} : vector<32x128xf32>, vector<128x128xf32>, vector<32x128xf32> -> vector<32x128xf32>
    %11 = vector.broadcast %9 : vector<1x128xf32> to vector<32x128xf32>
    %12 = arith.addf %10, %11 : vector<32x128xf32>
    %cst_9 = arith.constant 0.000000e+00 : f32
    %13 = vector.broadcast %cst_9 : f32 to vector<32x128xf32>
    %14 = arith.maximumf %12, %13 : vector<32x128xf32>
    %c256 = arith.constant 256 : index
    %c0_10 = arith.constant 0 : index
    %15 = vector.load %arg2[%c256, %c0_10] : memref<384x128xf32, #tpu.memory_space<vmem>>, vector<128x128xf32>
    %c2 = arith.constant 2 : index
    %c0_11 = arith.constant 0 : index
    %16 = vector.load %arg3[%c2, %c0_11] : memref<8x128xf32, #tpu.memory_space<vmem>>, vector<1x128xf32>
    %cst_12 = arith.constant dense<0.000000e+00> : vector<32x128xf32>
    %17 = tpu.matmul %14, %15, %cst_12 {dimension_numbers = #tpu.dot_dimension_numbers<[1], [0], [0], [1], [0, 0, 1, 1], [], []>} : vector<32x128xf32>, vector<128x128xf32>, vector<32x128xf32> -> vector<32x128xf32>
    %18 = vector.broadcast %16 : vector<1x128xf32> to vector<32x128xf32>
    %19 = arith.addf %17, %18 : vector<32x128xf32>
    %c0_13 = arith.constant 0 : index
    %c0_14 = arith.constant 0 : index
    %20 = vector.load %arg4[%c0_13, %c0_14] : memref<32x128xf32, #tpu.memory_space<vmem>>, vector<32x128xf32>
    tpu.vector_store %arg4[%c0_13, %c0_14], %19 {strides = array<i32>} : memref<32x128xf32, #tpu.memory_space<vmem>>, vector<32x128xf32>,
    return
  }
  func.func @transform_0(%arg0: i32) -> (i32, i32) {
    %c0_i32 = arith.constant 0 : i32
    %c0_i32_0 = arith.constant 0 : i32
    return %arg0, %c0_i32 : i32, i32
  }
  func.func @transform_1(%arg0: i32) -> (i32, i32) {
    %c0_i32 = arith.constant 0 : i32
    %c0_i32_0 = arith.constant 0 : i32
    %c0_i32_1 = arith.constant 0 : i32
    return %c0_i32, %c0_i32_0 : i32, i32
  }
  func.func @transform_2(%arg0: i32) -> (i32, i32) {
    %c0_i32 = arith.constant 0 : i32
    %c0_i32_0 = arith.constant 0 : i32
    %c0_i32_1 = arith.constant 0 : i32
    return %c0_i32, %c0_i32_0 : i32, i32
  }
  func.func @transform_3(%arg0: i32) -> (i32, i32) {
    %c0_i32 = arith.constant 0 : i32
    %c0_i32_0 = arith.constant 0 : i32
    return %arg0, %c0_i32 : i32, i32
  }
}

</mosaic_0001>

<bundles_post_ra>
// kernel: tpu_custom_call.1
= control target key start
LH: loop header
LB: loop body
LE: loop exit
PB: predicated region body
PF: predicated region fallthrough
CT: control target
= control target key end

     0   :  { %8 = vsyncpa [#allocation3], 0  ;;  %s1474_s0 = inlined_call_operand.hbm [shape: f32[64,128], index: 0, kind: input, shape index: {}]   ;;  %s1475_s1 = inlined_call_operand.hbm [shape: f32[384,128], index: 1, kind: input, shape index: {}]   ;;  %s1476_s2 = inlined_call_operand.hbm [shape: f32[8,128], index: 2, kind: input, shape index: {}]   ;;  %s1477_s3 = inlined_call_operand.hbm [shape: f32[64,128], index: 3, kind: output, shape index: {}]  }
   0x1   :  { %10 = vsyncpa [#allocation3 + $0x1], 0 }
   0x2   :  { %11 = vsyncpa [#allocation6], 0 }
   0x3   :  { %12 = vsyncpa [#allocation4], 0 }
   0x4   :  { %14 = vsyncpa [#allocation4 + $0x1], 0  ;;  %s1224_s12 = smov 0   ;;  %s1226_s13 = smov 0  }
   0x5   :  { %s1228_s14 = smov 0   ;;  %s1230_s15 = smov 0  }
   0x6 LB: > { %s1245_s16 = sadd.s32 4294967295, %s1194_s15   ;;  %s658_s17 = sadd.s32 4294967294, %s1194_s15   ;;  %s1194_s15 = sphi %s1230_s15, %s1497_s15   ;;  %s1190_s14 = sphi %s1228_s14, %s1496_s14   ;;  %s1186_s13 = sphi %s1226_s13, %s1495_s13   ;;  %s1182_s12 = sphi %s1224_s12, %s1494_s12  }
   0x7   : > { %p40_p0 = scmp.ne.s32.totalorder %s1186_s13, %s1182_s12  ;;  %p1478_p1 = scmp.eq.s32.totalorder %s1245_s16, 0 }
   0x8   : > { %p112_p3 = scmp.eq.s32.totalorder %s658_s17, 1  ;;  %p659_p5 = scmp.ge.s32.totalorder %s1194_s15, 1 }
   0x9   : > { %p1254_p4 = por %p1478_p1, %p40_p0  ;;  %p119_p7 = scmp.lt.s32.totalorder %s1194_s15, 3 }
   0xa   : > { %p1259_p6 = por %p112_p3, %p40_p0  ;;  %s1196_s21 = smov [#allocation5]  }
   0xb   : > { %s1481_s18 = scalar_select %p1254_p4, 1, 0 }
   0xc   : > { %s1482_s19 = scalar_select %p1259_p6, 1, 0 }
   0xd   : > { %p1264_p8 = pnand %p659_p5, %p119_p7  ;;  %s131_s22 = sshll.u32 %s1196_s21, 4  ;;  %s1268_s22 = int_to_ptr.vmem [resolvable:$true] %s131_s22 }
   0xe   : > { %s1197_s24 = smov [#allocation7]   ;;  %s1038_s28 = scalar_lea.hbm %s1475_s1, 6144 }
   0xf   : > { %p979_p9 = pneg %p1264_p8  ;;  %s145_s25 = sshll.u32 %s1197_s24, 4  ;;  %s1279_s25 = int_to_ptr.vmem [resolvable:$true] %s145_s25 }
  0x10   : > { %p1039_p12 = scmp.ne.s32.totalorder %s1475_s1, %s1038_s28  ;;  %p1045_p5 = scmp.lt.u32.totalorder %s1038_s28, %s1475_s1 }
  0x11   : > { %p1275_p11 = pnand %p979_p9, %p1478_p1 }
  0x13   : > { %p1040_p13 = pneg %p1275_p11 }
  0x15   : > { %p1041_p0 = pnand %p1040_p13, %p1039_p12 }
  0x17   : > { %p1042_p3 = pneg %p1041_p0 }
  0x19   : > { %p1047_p7 = pnand %p1045_p5, %p1042_p3 }
  0x1b   : > { %1050 = shalt.err (!%p1047_p7)
}
  0x1c   : > { %s1051_s6 = scalar_lea.vmem %s1268_s22, 6144  ;;  %p1059_p2 = scmp.lt.s32.totalorder %s1268_s22, %s1268_s22 }
  0x1d   : > { %p1052_p9 = scmp.ne.s32.totalorder %s1268_s22, %s1051_s6  ;;  %p1060_p12 = scmp.lt.s32.totalorder %s1051_s6, %s1051_s6 }
  0x1f   : > { %p1054_p10 = pnand %p1052_p9, %p1040_p13  ;;  %p1061_p0 = por %p1060_p12, %p1059_p2 }
  0x21   : > { %p1055_p1 = pneg %p1054_p10 }
  0x23   : > { %p1062_p6 = pnand %p1061_p0, %p1055_p1 }
  0x25   : > { %1065 = shalt.err (!%p1062_p6)
}
  0x26   : > { %s1198_s7 = smov 128   ;;  %s1199_s8 = smov 8  }
  0x27   : > { %982 = dma.hbm_to_vmem [thread:$0]  (!%p1275_p11), %s1475_s1, 6144, %s1268_s22, [#allocation6], %s1198_s7, %s1198_s7, %s1199_s8  }
  0x28   : > { %s1066_s21 = scalar_lea.hbm %s1476_s2, 128 }
  0x29   : > { %p1067_p1 = scmp.ne.s32.totalorder %s1476_s2, %s1066_s21  ;;  %p1073_p10 = scmp.lt.u32.totalorder %s1066_s21, %s1476_s2 }
  0x2b   : > { %p1069_p2 = pnand %p1067_p1, %p1040_p13 }
  0x2d   : > { %p1070_p6 = pneg %p1069_p2 }
  0x2f   : > { %p1075_p3 = pnand %p1073_p10, %p1070_p6 }
  0x31   : > { %1078 = shalt.err (!%p1075_p3)
}
  0x32   : > { %s1079_s22 = scalar_lea.vmem %s1279_s25, 128  ;;  %p1087_p12 = scmp.lt.s32.totalorder %s1279_s25, %s1279_s25 }
  0x33   : > { %p1080_p5 = scmp.ne.s32.totalorder %s1279_s25, %s1079_s22  ;;  %p1088_p0 = scmp.lt.s32.totalorder %s1079_s22, %s1079_s22 }
  0x35   : > { %p1082_p7 = pnand %p1080_p5, %p1040_p13  ;;  %p1089_p1 = por %p1088_p0, %p1087_p12 }
  0x37   : > { %p1083_p9 = pneg %p1082_p7 }
  0x39   : > { %p1090_p2 = pnand %p1089_p1, %p1083_p9 }
  0x3b   : > { %1093 = shalt.err (!%p1090_p2)
}
  0x3c   : > { %985 = dma.hbm_to_vmem [thread:$0]  (!%p1275_p11), %s1476_s2, 128, %s1279_s25, [#allocation6]  }
  0x3d   : > { %s1337_s4 = sadd.s32 1, %s1194_s15   ;;  %s27_s23 = sadd.s32 1, %s1190_s14 }
  0x3e   : > { %s24_s5 = ssub.s32 %s1194_s15, %s1337_s4  ;;  %p34_p13 = scmp.ne.s32.totalorder %s1190_s14, %s1186_s13 }
  0x3f   : > { %p25_p6 = scmp.eq.s32.totalorder %s24_s5, 0  ;;  %p35_p10 = scmp.eq.s32.totalorder %s1194_s15, 0 }
  0x40   : > { %p1485_p3 = scmp.eq.s32.totalorder %s1245_s16, 1  ;;  %p996_p7 = scmp.lt.s32.totalorder %s1194_s15, 2 }
  0x41   : > { %s1353_s9 = scalar_select %p25_p6, %s1190_s14, %s27_s23  }
  0x42   : > { %p1347_p5 = por %p1485_p3, %p34_p13  ;;  %p36_p9 = por %p35_p10, %p34_p13 }
  0x43   : > { %s156_s10 = sand.u32 1, %s1190_s14   ;;  %s679_s25 = sshll.u32 %s1194_s15, 9 }
  0x44   : > { %s1486_s6 = scalar_select %p1347_p5, 1, 0 }
  0x45   : > { %s663_s11 = sshll.u32 %s156_s10, 5  ;;  %s1360_s24 = scalar_lea.hbm %s1474_s0, %s679_s25 }
  0x46   : > { %s160_s26 = scalar_lea.vmem [#allocation2], %s663_s11  ;;  %p1364_p11 = pnand %p996_p7, %p36_p9 }
  0x47   : > { %s167_s27 = sshll.u32 %s160_s26, 4  ;;  %s1368_s22 = scalar_lea.sflag [#allocation3], %s156_s10  ;;  %s1362_s27 = int_to_ptr.vmem [resolvable:$true] %s167_s27 }
  0x48   : > { %s1094_s29 = scalar_lea.hbm %s1360_s24, 512  ;;  %p1096_p0 = pneg %p1364_p11 }
  0x49   : > { %p1095_p12 = scmp.ne.s32.totalorder %s1360_s24, %s1094_s29  ;;  %s1099_s5 = scalar_lea.hbm %s1474_s0, 1024 }
  0x4a   : > { %p1100_p13 = scmp.lt.u32.totalorder %s1360_s24, %s1474_s0  ;;  %p1101_p6 = scmp.lt.u32.totalorder %s1099_s5, %s1094_s29 }
  0x4b   : > { %p1097_p1 = pnand %p1096_p0, %p1095_p12  ;;  %p1103_p3 = scmp.lt.u32.totalorder %s1094_s29, %s1360_s24 }
  0x4c   : > { %p1102_p10 = por %p1101_p6, %p1100_p13 }
  0x4d   : > { %p1098_p2 = pneg %p1097_p1 }
  0x4e   : > { %p1104_p7 = por %p1103_p3, %p1102_p10 }
  0x50   : > { %p1105_p9 = pnand %p1104_p7, %p1098_p2 }
  0x52   : > { %1108 = shalt.err (!%p1105_p9)
}
  0x53   : > { %s1109_s10 = scalar_lea.vmem %s1362_s27, 512  ;;  %s1200_s17 = smov [#allocation2]  }
  0x54   : > { %p1110_p12 = scmp.ne.s32.totalorder %s1362_s27, %s1109_s10  ;;  %s1114_s21 = sshll.u32 %s1200_s17, 4  ;;  %s1115_s21 = int_to_ptr.vmem [resolvable:$false] %s1114_s21 }
  0x55   : > { %s1116_s26 = scalar_lea.vmem %s1115_s21, 1024  ;;  %p1117_p4 = scmp.lt.s32.totalorder %s1362_s27, %s1115_s21 }
  0x56   : > { %p1112_p1 = pnand %p1110_p12, %p1096_p0  ;;  %p1118_p13 = scmp.lt.s32.totalorder %s1116_s26, %s1109_s10 }
  0x58   : > { %p1113_p5 = pneg %p1112_p1  ;;  %p1119_p6 = por %p1118_p13, %p1117_p4 }
  0x5a   : > { %p1120_p10 = pnand %p1119_p6, %p1113_p5 }
  0x5c   : > { %1123 = shalt.err (!%p1120_p10)
}
  0x5d   : > { %989 = dma.hbm_to_vmem [thread:$0]  (!%p1364_p11), %s1360_s24, 512, %s1362_s27, %s1368_s22, %s1198_s7, %s1198_s7, %s1199_s8  }
  0x5e   : > { %179 = sbr.rel (%p1264_p8) target bundleno = 810 (0x32a), region = 32  ;;  %s1402_s29 = sand.u32 (!%p1264_p8), 1, %s1186_s13  }
  0x5f   : > { %s667_s30 = sshll.u32 (!%p1264_p8), %s1402_s29, 5  ;;  %s182_s23 = scalar_lea.sflag (!%p1264_p8), [#allocation3], %s1402_s29 }
  0x60   : > { %s1408_s28 = scalar_lea.vmem (!%p1264_p8), [#allocation2], %s667_s30  ;;  %p1488_p4 = scmp.ne.s32.totalorder (!%p1264_p8), %s1481_s18, 0 }
  0x65   : > { %1169 = dma.done.wait (%p1488_p4), %s182_s23, 512  }
  0x66   : > { %1171 = vsyncadd (%p1488_p4), %s182_s23, 4294966784  ;;  %p1489_p5 = scmp.eq.s32.totalorder %s1245_s16, 0 }
  0x68   : > { %1173 = dma.done.wait (%p1489_p5), [#allocation6], 6272   ;;  %p1490_p8 = pmov %p1489_p5 }
  0x69   : > { %v222_v0 = vld [vmem:[#allocation5] sm:$0xff]  ;;  %v223_v1 = vld [vmem:[#allocation5 + $0x8] sm:$0xff]  ;;  %v224_v2 = vld [vmem:[#allocation5 + $0x10] sm:$0xff]  ;;  %s215_s18 = scalar_lea.vmem [#allocation8], %s667_s30  ;;  %s680_s7 = sshll.u32 %s1245_s16, 9 }
  0x6a   : > { %1175 = vsyncadd (%p1490_p8), [#allocation6], 4294961024  ;;  %v855_v3 = vpack.c.bf16 %v223_v1, %v222_v0  ;;  %v225_v4 = vld [vmem:[#allocation5 + $0x18] sm:$0xff]  ;;  %v226_v6 = vld [vmem:[#allocation5 + $0x20] sm:$0xff]  ;;  %s566_s20 = sshll.u32 %s215_s18, 4  ;;  %s1430_s27 = scalar_lea.hbm %s1477_s3, %s680_s7  ;;  %s1425_s20 = int_to_ptr.vmem [resolvable:$true] %s566_s20 }
  0x6b   : > { %v859_v5 = vpack.c.bf16 %v225_v4, %v224_v2  ;;  %v227_v7 = vld [vmem:[#allocation5 + $0x28] sm:$0xff]  ;;  %v218_v9 = vld [vmem:[%s1408_s28] sm:$0xff]  ;;  %v228_v10 = vld [vmem:[#allocation5 + $0x30] sm:$0xff]  ;;  %s553_s22 = scalar_lea.sflag [#allocation4], %s1402_s29  ;;  %s1124_s16 = scalar_lea.vmem %s1425_s20, 512 }
  0x6c   : > { %856 = vmatprep.subr.bf16.mxu0 %v855_v3  ;;  %v863_v8 = vpack.c.bf16 %v227_v7, %v226_v6  ;;  %v229_v11 = vld [vmem:[#allocation5 + $0x38] sm:$0xff]  ;;  %773 = vmatprep.mubr.f32.mxu0 %v218_v9  ;;  %v332_v12 = vld [vmem:[#allocation5 + $0x80] sm:$0xff]  ;;  %v333_v13 = vld [vmem:[#allocation5 + $0x88] sm:$0xff]  ;;  %p1125_p11 = scmp.ne.s32.totalorder %s1425_s20, %s1124_s16  ;;  %p1491_p0 = scmp.ne.s32.totalorder %s1486_s6, 0 }
  0x6d   : > { %858 = vmatpush3.bf16.msra.mxu0 %v855_v3  ;;  %v334_v14 = vld [vmem:[#allocation5 + $0x90] sm:$0xff]  ;;  %v335_v15 = vld [vmem:[#allocation5 + $0x98] sm:$0xff]  ;;  %v887_v16 = vpack.c.bf16 %v333_v13, %v332_v12  ;;  %v867_v18 = vpack.c.bf16 %v229_v11, %v228_v10  ;;  %v336_v19 = vld [vmem:[#allocation5 + $0xa0] sm:$0xff]  ;;  %s1201_s5 = smov [#allocation8]  }
  0x6e   : > { %860 = vmatprep.subr.bf16.mxu0 %v859_v5  ;;  %v891_v17 = vpack.c.bf16 %v335_v15, %v334_v14  ;;  %v337_v20 = vld [vmem:[#allocation5 + $0xa8] sm:$0xff]  ;;  %v230_v21 = vld [vmem:[#allocation5 + $0x40] sm:$0xff]  ;;  %v338_v25 = vld [vmem:[#allocation5 + $0xb0] sm:$0xff]  ;;  %p1126_p2 = pnand %p1125_p11, %p1491_p0  ;;  %s1128_s11 = sshll.u32 %s1201_s5, 4  ;;  %s1129_s11 = int_to_ptr.vmem [resolvable:$false] %s1128_s11 }
  0x6f   : > { %v231_v22 = vld [vmem:[#allocation5 + $0x48] sm:$0xff]  ;;  %888 = vmatprep.subr.bf16.mxu1 %v887_v16  ;;  %v895_v23 = vpack.c.bf16 %v337_v20, %v336_v19  ;;  %v339_v26 = vld [vmem:[#allocation5 + $0xb8] sm:$0xff]  ;;  %v232_v27 = vld [vmem:[#allocation5 + $0x50] sm:$0xff]  ;;  %s1130_s25 = scalar_lea.vmem %s1129_s11, 1024  ;;  %p1131_p7 = scmp.lt.s32.totalorder %s1425_s20, %s1129_s11 }
  0x70   : > { %890 = vmatpush3.bf16.msra.mxu1 %v887_v16  ;;  %v871_v24 = vpack.c.bf16 %v231_v22, %v230_v21  ;;  %v233_v28 = vld [vmem:[#allocation5 + $0x58] sm:$0xff]  ;;  %v899_v29 = vpack.c.bf16 %v339_v26, %v338_v25  ;;  %v340_v31 = vld [vmem:[#allocation5 + $0xc0] sm:$0xff]  ;;  %v341_v32 = vld [vmem:[#allocation5 + $0xc8] sm:$0xff]  ;;  %p1127_p3 = pneg %p1126_p2  ;;  %p1132_p9 = scmp.lt.s32.totalorder %s1130_s25, %s1124_s16 }
  0x71   : > { %862 = vmatpush3.bf16.msra.mxu0 %v859_v5  ;;  %892 = vmatprep.subr.bf16.mxu1 %v891_v17  ;;  %v875_v30 = vpack.c.bf16 %v233_v28, %v232_v27  ;;  %v234_v33 = vld [vmem:[#allocation5 + $0x60] sm:$0xff]  ;;  %v235_v34 = vld [vmem:[#allocation5 + $0x68] sm:$0xff]  ;;  %v903_v35 = vpack.c.bf16 %v341_v32, %v340_v31  ;;  %v342_v37 = vld [vmem:[#allocation5 + $0xd0] sm:$0xff] }
  0x72   : > { %864 = vmatprep.subr.bf16.mxu0 %v863_v8  ;;  %v879_v36 = vpack.c.bf16 %v235_v34, %v234_v33  ;;  %v343_v38 = vld [vmem:[#allocation5 + $0xd8] sm:$0xff]  ;;  %v236_v39 = vld [vmem:[#allocation5 + $0x70] sm:$0xff]  ;;  %v344_v43 = vld [vmem:[#allocation5 + $0xe0] sm:$0xff]  ;;  %p1133_p12 = por %p1132_p9, %p1131_p7 }
  0x73   : > { %v237_v40 = vld [vmem:[#allocation5 + $0x78] sm:$0xff]  ;;  %v907_v41 = vpack.c.bf16 %v343_v38, %v342_v37  ;;  %v345_v44 = vld [vmem:[#allocation5 + $0xe8] sm:$0xff]  ;;  %v220_v47 = vld [vmem:[%s1408_s28 + $0x10] sm:$0xff] }
  0x74   : > { %894 = vmatpush3.bf16.msra.mxu1 %v891_v17  ;;  %v883_v42 = vpack.c.bf16 %v237_v40, %v236_v39  ;;  %v911_v45 = vpack.c.bf16 %v345_v44, %v344_v43  ;;  %v219_v46 = vld [vmem:[%s1408_s28 + $0x8] sm:$0xff]  ;;  %v221_v48 = vld [vmem:[%s1408_s28 + $0x18] sm:$0xff]  ;;  %v346_v49 = vld [vmem:[#allocation5 + $0xf0] sm:$0xff]  ;;  %p1134_p1 = pnand %p1133_p12, %p1127_p3 }
  0x75   : > { %866 = vmatpush3.bf16.msra.mxu0 %v863_v8  ;;  %896 = vmatprep.subr.bf16.mxu1 %v895_v23  ;;  %v347_v50 = vld [vmem:[#allocation5 + $0xf8] sm:$0xff]  ;;  %v442_v52 = vld [vmem:[#allocation5 + $0x100] sm:$0xff]  ;;  %v443_v53 = vld [vmem:[#allocation5 + $0x108] sm:$0xff] }
  0x76   : > { %868 = vmatprep.subr.bf16.mxu0 %v867_v18  ;;  %v915_v51 = vpack.c.bf16 %v347_v50, %v346_v49  ;;  %v444_v54 = vld [vmem:[#allocation5 + $0x110] sm:$0xff]  ;;  %v919_v55 = vpack.c.bf16 %v443_v53, %v442_v52  ;;  %v445_v56 = vld [vmem:[#allocation5 + $0x118] sm:$0xff]  ;;  %v446_v58 = vld [vmem:[#allocation5 + $0x120] sm:$0xff] }
  0x77   : > { %v923_v57 = vpack.c.bf16 %v445_v56, %v444_v54  ;;  %v447_v59 = vld [vmem:[#allocation5 + $0x128] sm:$0xff]  ;;  %v448_v61 = vld [vmem:[#allocation5 + $0x130] sm:$0xff]  ;;  %v449_v62 = vld [vmem:[#allocation5 + $0x138] sm:$0xff] }
  0x78   : > { %898 = vmatpush3.bf16.msra.mxu1 %v895_v23  ;;  %v927_v60 = vpack.c.bf16 %v447_v59, %v446_v58  ;;  %v931_v63 = vpack.c.bf16 %v449_v62, %v448_v61  ;;  %v450_v0 = vld [vmem:[#allocation5 + $0x140] sm:$0xff]  ;;  %v451_v1 = vld [vmem:[#allocation5 + $0x148] sm:$0xff]  ;;  %v452_v3 = vld [vmem:[#allocation5 + $0x150] sm:$0xff] }
  0x79   : > { %870 = vmatpush3.bf16.msra.mxu0 %v867_v18  ;;  %900 = vmatprep.subr.bf16.mxu1 %v899_v29  ;;  %v935_v2 = vpack.c.bf16 %v451_v1, %v450_v0  ;;  %v453_v4 = vld [vmem:[#allocation5 + $0x158] sm:$0xff]  ;;  %v454_v6 = vld [vmem:[#allocation5 + $0x160] sm:$0xff]  ;;  %v455_v7 = vld [vmem:[#allocation5 + $0x168] sm:$0xff] }
  0x7a   : > { %872 = vmatprep.subr.bf16.mxu0 %v871_v24  ;;  %v939_v5 = vpack.c.bf16 %v453_v4, %v452_v3  ;;  %v943_v8 = vpack.c.bf16 %v455_v7, %v454_v6  ;;  %v671_v9 = vld [vmem:[#allocation7] ss:$0 sm:$0xff]  ;;  %v456_v22 = vld [vmem:[#allocation5 + $0x170] sm:$0xff]  ;;  %v457_v23 = vld [vmem:[#allocation5 + $0x178] sm:$0xff] }
  0x7b   : > { %v672_v25 = vld [vmem:[#allocation7 + $0x1] ss:$0 sm:$0xff]  ;;  %v673_v38 = vld [vmem:[#allocation7 + $0x2] ss:$0 sm:$0xff] }
  0x7c   : > { %902 = vmatpush3.bf16.msra.mxu1 %v899_v29 }
  0x7d   : > { %874 = vmatpush3.bf16.msra.mxu0 %v871_v24  ;;  %904 = vmatprep.subr.bf16.mxu1 %v903_v35  ;;  %v947_v24 = vpack.c.bf16 %v457_v23, %v456_v22 }
  0x7e   : > { %876 = vmatprep.subr.bf16.mxu0 %v875_v30 }
  0x80   : > { %906 = vmatpush3.bf16.msra.mxu1 %v903_v35 }
  0x81   : > { %878 = vmatpush3.bf16.msra.mxu0 %v875_v30  ;;  %908 = vmatprep.subr.bf16.mxu1 %v907_v41 }
  0x82   : > { %880 = vmatprep.subr.bf16.mxu0 %v879_v36 }
  0x84   : > { %910 = vmatpush3.bf16.msra.mxu1 %v907_v41 }
  0x85   : > { %882 = vmatpush3.bf16.msra.mxu0 %v879_v36  ;;  %912 = vmatprep.subr.bf16.mxu1 %v911_v45 }
  0x86   : > { %884 = vmatprep.subr.bf16.mxu0 %v883_v42 }
  0x88   : > { %914 = vmatpush3.bf16.msra.mxu1 %v911_v45 }
  0x89   : > { %886 = vmatpush3.bf16.msra.mxu0 %v883_v42  ;;  %916 = vmatprep.subr.bf16.mxu1 %v915_v51 }
  0x8a   : > { %920 = vmatprep.subr.bf16.mxu0 %v919_v55 }
  0x8c   : > { %774 = vmatmul.mubr.f32.vlgmr.msra.gmra.mrb[0].mxu0 %v219_v46  ;;  %918 = vmatpush3.bf16.msra.mxu1 %v915_v51 }
  0x8d   : > { %776 = vmatprep.mubr.f32.mxu0 %v220_v47  ;;  %951 = vmatprep.subr.bf16.mxu1 %v919_v55 }
  0x8e   : > { %922 = vmatpush3.bf16.msra.mxu0 %v919_v55 }
  0x8f   : > { %924 = vmatprep.subr.bf16.mxu0 %v923_v57 }
  0x90   : > { %777 = vmatmul.mubr.f32.gmra.mrb[2].mxu0 %v221_v48 }
  0x92   : > { %926 = vmatpush3.bf16.msra.mxu0 %v923_v57 }
  0x93   : > { %928 = vmatprep.subr.bf16.mxu0 %v927_v60 }
  0x96   : > { %930 = vmatpush3.bf16.msra.mxu0 %v927_v60 }
  0x97   : > { %932 = vmatprep.subr.bf16.mxu0 %v931_v63 }
  0x9a   : > { %934 = vmatpush3.bf16.msra.mxu0 %v931_v63 }
  0x9b   : > { %936 = vmatprep.subr.bf16.mxu0 %v935_v2 }
  0x9e   : > { %938 = vmatpush3.bf16.msra.mxu0 %v935_v2 }
  0x9f   : > { %940 = vmatprep.subr.bf16.mxu0 %v939_v5 }
  0xa2   : > { %942 = vmatpush3.bf16.msra.mxu0 %v939_v5 }
  0xa3   : > { %944 = vmatprep.subr.bf16.mxu0 %v943_v8 }
  0xa6   : > { %946 = vmatpush3.bf16.msra.mxu0 %v943_v8 }
  0xa7   : > { %948 = vmatprep.subr.bf16.mxu0 %v947_v24 }
  0xaa   : > { %950 = vmatpush3.bf16.msra.mxu0 %v947_v24 }
 0x15f   : > { %v775_v10 = vpop.f32.mrb[0].mxu0 }
 0x160   : > { %v315_v11 = vadd.f32 %v775_v10, %v671_v9  ;;  %v309_v12 = vpop.f32.mrb[1].mxu0 }
 0x161   : > { %v310_v13 = vadd.f32 %v671_v9, %v309_v12 }
 0x162   : > { %v329_v16 = vmax.f32 %v315_v11, 0.0 }
 0x163   : > { %v778_v14 = vpop.f32.mrb[2].mxu0  ;;  %v328_v15 = vmax.f32 %v310_v13, 0.0 }
 0x164   : > { %v325_v17 = vadd.f32 %v778_v14, %v671_v9  ;;  %v319_v18 = vpop.f32.mrb[3].mxu0 }
 0x165   : > { %v320_v19 = vadd.f32 %v671_v9, %v319_v18  ;;  %811 = vmatprep.mubr.f32.mxu1 %v328_v15 }
 0x166   : > { %812 = vmatmul.mubr.f32.vlgmr.msra.gmra.mrb[0].mxu1 %v329_v16  ;;  %v331_v21 = vmax.f32 %v325_v17, 0.0 }
 0x167   : > { %v330_v20 = vmax.f32 %v320_v19, 0.0  ;;  %959 = vmatpush3.bf16.msra.mxu1 %v919_v55 }
 0x168   : > { %952 = vmatprep.subr.bf16.mxu1 %v923_v57 }
 0x169   : > { %814 = vmatprep.mubr.f32.mxu1 %v330_v20 }
 0x16a   : > { %815 = vmatmul.mubr.f32.gmra.mrb[2].mxu1 %v331_v21 }
 0x16b   : > { %960 = vmatpush3.bf16.msra.mxu1 %v923_v57 }
 0x16c   : > { %953 = vmatprep.subr.bf16.mxu1 %v927_v60 }
 0x16f   : > { %961 = vmatpush3.bf16.msra.mxu1 %v927_v60 }
 0x170   : > { %954 = vmatprep.subr.bf16.mxu1 %v931_v63 }
 0x173   : > { %962 = vmatpush3.bf16.msra.mxu1 %v931_v63 }
 0x174   : > { %955 = vmatprep.subr.bf16.mxu1 %v935_v2 }
 0x177   : > { %963 = vmatpush3.bf16.msra.mxu1 %v935_v2 }
 0x178   : > { %956 = vmatprep.subr.bf16.mxu1 %v939_v5 }
 0x17b   : > { %964 = vmatpush3.bf16.msra.mxu1 %v939_v5 }
 0x17c   : > { %957 = vmatprep.subr.bf16.mxu1 %v943_v8 }
 0x17f   : > { %965 = vmatpush3.bf16.msra.mxu1 %v943_v8 }
 0x180   : > { %958 = vmatprep.subr.bf16.mxu1 %v947_v24 }
 0x183   : > { %966 = vmatpush3.bf16.msra.mxu1 %v947_v24 }
 0x239   : > { %v813_v26 = vpop.f32.mrb[0].mxu1 }
 0x23a   : > { %v425_v27 = vadd.f32 %v813_v26, %v672_v25  ;;  %v419_v28 = vpop.f32.mrb[1].mxu1 }
 0x23b   : > { %v420_v29 = vadd.f32 %v672_v25, %v419_v28 }
 0x23c   : > { %v439_v32 = vmax.f32 %v425_v27, 0.0 }
 0x23d   : > { %v438_v30 = vmax.f32 %v420_v29, 0.0  ;;  %v816_v31 = vpop.f32.mrb[2].mxu1 }
 0x23e   : > { %v435_v33 = vadd.f32 %v816_v31, %v672_v25  ;;  %v429_v34 = vpop.f32.mrb[3].mxu1 }
 0x23f   : > { %v430_v35 = vadd.f32 %v672_v25, %v429_v34  ;;  %849 = vmatprep.mubr.f32.mxu0 %v438_v30 }
 0x240   : > { %850 = vmatmul.mubr.f32.vlgmr.msra.gmra.mrb[4].mxu0 %v439_v32  ;;  %v441_v37 = vmax.f32 %v435_v33, 0.0 }
 0x241   : > { %v440_v36 = vmax.f32 %v430_v35, 0.0 }
 0x243   : > { %852 = vmatprep.mubr.f32.mxu1 %v440_v36 }
 0x244   : > { %853 = vmatmul.mubr.f32.vlgmr.msra.gmra.mrb[4].mxu1 %v441_v37 }
 0x313   : > { %v851_v39 = vpop.f32.mrb[4].mxu0 }
 0x314   : > { %v535_v40 = vadd.f32 %v851_v39, %v673_v38  ;;  %v529_v41 = vpop.f32.mrb[5].mxu0 }
 0x315   : > { %v530_v42 = vadd.f32 %v673_v38, %v529_v41 }
 0x316   : > { %549 = vst [vmem:[%s215_s18 + $0x8] sm:$0xff] %v535_v40 }
 0x317   : > { %548 = vst [vmem:[%s215_s18] sm:$0xff] %v530_v42  ;;  %v854_v43 = vpop.f32.mrb[4].mxu1 }
 0x318   : > { %v545_v44 = vadd.f32 %v854_v43, %v673_v38  ;;  %v539_v45 = vpop.f32.mrb[5].mxu1 }
 0x319   : > { %v540_v46 = vadd.f32 %v673_v38, %v539_v45 }
 0x31a   : > { %551 = vst [vmem:[%s215_s18 + $0x18] sm:$0xff] %v545_v44 }
 0x31b   : > { %550 = vst [vmem:[%s215_s18 + $0x10] sm:$0xff] %v540_v46 }
 0x31c   : > { %1137 = shalt.err (!%p1134_p1)
}
 0x31d   : > { %s1138_s10 = scalar_lea.hbm %s1430_s27, 512  ;;  %s1142_s26 = scalar_lea.hbm %s1477_s3, 1024 }
 0x31e   : > { %p1139_p13 = scmp.ne.s32.totalorder %s1430_s27, %s1138_s10  ;;  %p1143_p4 = scmp.lt.u32.totalorder %s1430_s27, %s1477_s3 }
 0x31f   : > { %p1144_p5 = scmp.lt.u32.totalorder %s1142_s26, %s1138_s10  ;;  %p1146_p11 = scmp.lt.u32.totalorder %s1138_s10, %s1430_s27 }
 0x320   : > { %p1140_p6 = pnand %p1139_p13, %p1491_p0 }
 0x321   : > { %p1145_p8 = por %p1144_p5, %p1143_p4 }
 0x322   : > { %p1141_p10 = pneg %p1140_p6 }
 0x323   : > { %p1147_p2 = por %p1146_p11, %p1145_p8 }
 0x325   : > { %p1148_p3 = pnand %p1147_p2, %p1141_p10 }
 0x327   : > { %1151 = shalt.err (!%p1148_p3)
}
 0x328   : > { %s1202_s28 = smov 128   ;;  %s1203_s18 = smov 8  }
 0x329   : > { %977 = dma.vmem_to_hbm [thread:$0]  (%p1491_p0), %s1425_s20, 512, %s1430_s27, %s553_s22, %s1202_s28, %s1202_s28, %s1203_s18  }
 0x32a PF: > { %s581_s7 = sand.u32 1, %s1182_s12   ;;  %p1492_p7 = scmp.ne.s32.totalorder %s1482_s19, 0 }
 0x32b   : > { %p1493_p9 = scmp.ge.s32.totalorder %s1194_s15, 2  ;;  %s582_s8 = scalar_lea.sflag [#allocation4], %s581_s7 }
 0x32d   : > { %p991_p12 = pnand %p1493_p9, %p1492_p7 }
 0x32f   : > { %1177 = dma.done.wait (!%p991_p12), %s582_s8, 512  }
 0x330   : > { %1179 = vsyncadd (!%p991_p12), %s582_s8, 4294966784  ;;  %p17_p1 = scmp.ge.s32.totalorder %s1337_s4, 4   ;;  %s1494_s12 = smov %s1186_s13 }
 0x331   : > { %s1495_s13 = smov %s1190_s14  ;;  %s1496_s14 = smov %s1353_s9 }
 0x332   : > { %s1497_s15 = smov %s1337_s4  ;;  %19 = sbr.rel (!%p17_p1) target bundleno = 6 (0x6), region = 85 }
 0x339   :  { %587 = vsyncpa [#allocation3], 1 }
 0x33a   :  { %589 = vsyncpa [#allocation3 + $0x1], 1 }
 0x33b   :  { %590 = vsyncpa [#allocation6], 1 }
 0x33c   :  { %591 = vsyncpa [#allocation4], 1 }
 0x33d   :  { %593 = vsyncpa [#allocation4 + $0x1], 1 }

// kernel: tpu_custom_call.1
= control target key start
LH: loop header
LB: loop body
LE: loop exit
PB: predicated region body
PF: predicated region fallthrough
CT: control target
= control target key end

     0   :  { %8 = vsyncpa [#allocation3], 0  ;;  %s1474_s0 = inlined_call_operand.hbm [shape: f32[64,128], index: 0, kind: input, shape index: {}]   ;;  %s1475_s1 = inlined_call_operand.hbm [shape: f32[384,128], index: 1, kind: input, shape index: {}]   ;;  %s1476_s2 = inlined_call_operand.hbm [shape: f32[8,128], index: 2, kind: input, shape index: {}]   ;;  %s1477_s3 = inlined_call_operand.hbm [shape: f32[64,128], index: 3, kind: output, shape index: {}]  }
   0x1   :  { %10 = vsyncpa [#allocation3 + $0x1], 0 }
   0x2   :  { %11 = vsyncpa [#allocation6], 0 }
   0x3   :  { %12 = vsyncpa [#allocation4], 0 }
   0x4   :  { %14 = vsyncpa [#allocation4 + $0x1], 0  ;;  %s1224_s12 = smov 0   ;;  %s1226_s13 = smov 0  }
   0x5   :  { %s1228_s14 = smov 0   ;;  %s1230_s15 = smov 0  }
   0x6 LB: > { %s1245_s16 = sadd.s32 4294967295, %s1194_s15   ;;  %s658_s17 = sadd.s32 4294967294, %s1194_s15   ;;  %s1194_s15 = sphi %s1230_s15, %s1497_s15   ;;  %s1190_s14 = sphi %s1228_s14, %s1496_s14   ;;  %s1186_s13 = sphi %s1226_s13, %s1495_s13   ;;  %s1182_s12 = sphi %s1224_s12, %s1494_s12  }
   0x7   : > { %p40_p0 = scmp.ne.s32.totalorder %s1186_s13, %s1182_s12  ;;  %p1478_p1 = scmp.eq.s32.totalorder %s1245_s16, 0 }
   0x8   : > { %p112_p3 = scmp.eq.s32.totalorder %s658_s17, 1  ;;  %p659_p5 = scmp.ge.s32.totalorder %s1194_s15, 1 }
   0x9   : > { %p1254_p4 = por %p1478_p1, %p40_p0  ;;  %p119_p7 = scmp.lt.s32.totalorder %s1194_s15, 3 }
   0xa   : > { %p1259_p6 = por %p112_p3, %p40_p0  ;;  %s1196_s21 = smov [#allocation5]  }
   0xb   : > { %s1481_s18 = scalar_select %p1254_p4, 1, 0 }
   0xc   : > { %s1482_s19 = scalar_select %p1259_p6, 1, 0 }
   0xd   : > { %p1264_p8 = pnand %p659_p5, %p119_p7  ;;  %s131_s22 = sshll.u32 %s1196_s21, 4  ;;  %s1268_s22 = int_to_ptr.vmem [resolvable:$true] %s131_s22 }
   0xe   : > { %s1197_s24 = smov [#allocation7]   ;;  %s1038_s28 = scalar_lea.hbm %s1475_s1, 6144 }
   0xf   : > { %p979_p9 = pneg %p1264_p8  ;;  %s145_s25 = sshll.u32 %s1197_s24, 4  ;;  %s1279_s25 = int_to_ptr.vmem [resolvable:$true] %s145_s25 }
  0x10   : > { %p1039_p12 = scmp.ne.s32.totalorder %s1475_s1, %s1038_s28  ;;  %p1045_p5 = scmp.lt.u32.totalorder %s1038_s28, %s1475_s1 }
  0x11   : > { %p1275_p11 = pnand %p979_p9, %p1478_p1 }
  0x13   : > { %p1040_p13 = pneg %p1275_p11 }
  0x15   : > { %p1041_p0 = pnand %p1040_p13, %p1039_p12 }
  0x17   : > { %p1042_p3 = pneg %p1041_p0 }
  0x19   : > { %p1047_p7 = pnand %p1045_p5, %p1042_p3 }
  0x1b   : > { %1050 = shalt.err (!%p1047_p7)
}
  0x1c   : > { %s1051_s6 = scalar_lea.vmem %s1268_s22, 6144  ;;  %p1059_p2 = scmp.lt.s32.totalorder %s1268_s22, %s1268_s22 }
  0x1d   : > { %p1052_p9 = scmp.ne.s32.totalorder %s1268_s22, %s1051_s6  ;;  %p1060_p12 = scmp.lt.s32.totalorder %s1051_s6, %s1051_s6 }
  0x1f   : > { %p1054_p10 = pnand %p1052_p9, %p1040_p13  ;;  %p1061_p0 = por %p1060_p12, %p1059_p2 }
  0x21   : > { %p1055_p1 = pneg %p1054_p10 }
  0x23   : > { %p1062_p6 = pnand %p1061_p0, %p1055_p1 }
  0x25   : > { %1065 = shalt.err (!%p1062_p6)
}
  0x26   : > { %s1198_s7 = smov 128   ;;  %s1199_s8 = smov 8  }
  0x27   : > { %982 = dma.hbm_to_vmem [thread:$0]  (!%p1275_p11), %s1475_s1, 6144, %s1268_s22, [#allocation6], %s1198_s7, %s1198_s7, %s1199_s8  }
  0x28   : > { %s1066_s21 = scalar_lea.hbm %s1476_s2, 128 }
  0x29   : > { %p1067_p1 = scmp.ne.s32.totalorder %s1476_s2, %s1066_s21  ;;  %p1073_p10 = scmp.lt.u32.totalorder %s1066_s21, %s1476_s2 }
  0x2b   : > { %p1069_p2 = pnand %p1067_p1, %p1040_p13 }
  0x2d   : > { %p1070_p6 = pneg %p1069_p2 }
  0x2f   : > { %p1075_p3 = pnand %p1073_p10, %p1070_p6 }
  0x31   : > { %1078 = shalt.err (!%p1075_p3)
}
  0x32   : > { %s1079_s22 = scalar_lea.vmem %s1279_s25, 128  ;;  %p1087_p12 = scmp.lt.s32.totalorder %s1279_s25, %s1279_s25 }
  0x33   : > { %p1080_p5 = scmp.ne.s32.totalorder %s1279_s25, %s1079_s22  ;;  %p1088_p0 = scmp.lt.s32.totalorder %s1079_s22, %s1079_s22 }
  0x35   : > { %p1082_p7 = pnand %p1080_p5, %p1040_p13  ;;  %p1089_p1 = por %p1088_p0, %p1087_p12 }
  0x37   : > { %p1083_p9 = pneg %p1082_p7 }
  0x39   : > { %p1090_p2 = pnand %p1089_p1, %p1083_p9 }
  0x3b   : > { %1093 = shalt.err (!%p1090_p2)
}
  0x3c   : > { %985 = dma.hbm_to_vmem [thread:$0]  (!%p1275_p11), %s1476_s2, 128, %s1279_s25, [#allocation6]  }
  0x3d   : > { %s1337_s4 = sadd.s32 1, %s1194_s15   ;;  %s27_s23 = sadd.s32 1, %s1190_s14 }
  0x3e   : > { %s24_s5 = ssub.s32 %s1194_s15, %s1337_s4  ;;  %p34_p13 = scmp.ne.s32.totalorder %s1190_s14, %s1186_s13 }
  0x3f   : > { %p25_p6 = scmp.eq.s32.totalorder %s24_s5, 0  ;;  %p35_p10 = scmp.eq.s32.totalorder %s1194_s15, 0 }
  0x40   : > { %p1485_p3 = scmp.eq.s32.totalorder %s1245_s16, 1  ;;  %p996_p7 = scmp.lt.s32.totalorder %s1194_s15, 2 }
  0x41   : > { %s1353_s9 = scalar_select %p25_p6, %s1190_s14, %s27_s23  }
  0x42   : > { %p1347_p5 = por %p1485_p3, %p34_p13  ;;  %p36_p9 = por %p35_p10, %p34_p13 }
  0x43   : > { %s156_s10 = sand.u32 1, %s1190_s14   ;;  %s679_s25 = sshll.u32 %s1194_s15, 9 }
  0x44   : > { %s1486_s6 = scalar_select %p1347_p5, 1, 0 }
  0x45   : > { %s663_s11 = sshll.u32 %s156_s10, 5  ;;  %s1360_s24 = scalar_lea.hbm %s1474_s0, %s679_s25 }
  0x46   : > { %s160_s26 = scalar_lea.vmem [#allocation2], %s663_s11  ;;  %p1364_p11 = pnand %p996_p7, %p36_p9 }
  0x47   : > { %s167_s27 = sshll.u32 %s160_s26, 4  ;;  %s1368_s22 = scalar_lea.sflag [#allocation3], %s156_s10  ;;  %s1362_s27 = int_to_ptr.vmem [resolvable:$true] %s167_s27 }
  0x48   : > { %s1094_s29 = scalar_lea.hbm %s1360_s24, 512  ;;  %p1096_p0 = pneg %p1364_p11 }
  0x49   : > { %p1095_p12 = scmp.ne.s32.totalorder %s1360_s24, %s1094_s29  ;;  %s1099_s5 = scalar_lea.hbm %s1474_s0, 1024 }
  0x4a   : > { %p1100_p13 = scmp.lt.u32.totalorder %s1360_s24, %s1474_s0  ;;  %p1101_p6 = scmp.lt.u32.totalorder %s1099_s5, %s1094_s29 }
  0x4b   : > { %p1097_p1 = pnand %p1096_p0, %p1095_p12  ;;  %p1103_p3 = scmp.lt.u32.totalorder %s1094_s29, %s1360_s24 }
  0x4c   : > { %p1102_p10 = por %p1101_p6, %p1100_p13 }
  0x4d   : > { %p1098_p2 = pneg %p1097_p1 }
  0x4e   : > { %p1104_p7 = por %p1103_p3, %p1102_p10 }
  0x50   : > { %p1105_p9 = pnand %p1104_p7, %p1098_p2 }
  0x52   : > { %1108 = shalt.err (!%p1105_p9)
}
  0x53   : > { %s1109_s10 = scalar_lea.vmem %s1362_s27, 512  ;;  %s1200_s17 = smov [#allocation2]  }
  0x54   : > { %p1110_p12 = scmp.ne.s32.totalorder %s1362_s27, %s1109_s10  ;;  %s1114_s21 = sshll.u32 %s1200_s17, 4  ;;  %s1115_s21 = int_to_ptr.vmem [resolvable:$false] %s1114_s21 }
  0x55   : > { %s1116_s26 = scalar_lea.vmem %s1115_s21, 1024  ;;  %p1117_p4 = scmp.lt.s32.totalorder %s1362_s27, %s1115_s21 }
  0x56   : > { %p1112_p1 = pnand %p1110_p12, %p1096_p0  ;;  %p1118_p13 = scmp.lt.s32.totalorder %s1116_s26, %s1109_s10 }
  0x58   : > { %p1113_p5 = pneg %p1112_p1  ;;  %p1119_p6 = por %p1118_p13, %p1117_p4 }
  0x5a   : > { %p1120_p10 = pnand %p1119_p6, %p1113_p5 }
  0x5c   : > { %1123 = shalt.err (!%p1120_p10)
}
  0x5d   : > { %989 = dma.hbm_to_vmem [thread:$0]  (!%p1364_p11), %s1360_s24, 512, %s1362_s27, %s1368_s22, %s1198_s7, %s1198_s7, %s1199_s8  }
  0x5e   : > { %179 = sbr.rel (%p1264_p8) target bundleno = 810 (0x32a), region = 32  ;;  %s1402_s29 = sand.u32 (!%p1264_p8), 1, %s1186_s13  }
  0x5f   : > { %s667_s30 = sshll.u32 (!%p1264_p8), %s1402_s29, 5  ;;  %s182_s23 = scalar_lea.sflag (!%p1264_p8), [#allocation3], %s1402_s29 }
  0x60   : > { %s1408_s28 = scalar_lea.vmem (!%p1264_p8), [#allocation2], %s667_s30  ;;  %p1488_p4 = scmp.ne.s32.totalorder (!%p1264_p8), %s1481_s18, 0 }
  0x65   : > { %1169 = dma.done.wait (%p1488_p4), %s182_s23, 512  }
  0x66   : > { %1171 = vsyncadd (%p1488_p4), %s182_s23, 4294966784  ;;  %p1489_p5 = scmp.eq.s32.totalorder %s1245_s16, 0 }
  0x68   : > { %1173 = dma.done.wait (%p1489_p5), [#allocation6], 6272   ;;  %p1490_p8 = pmov %p1489_p5 }
  0x69   : > { %v222_v0 = vld [vmem:[#allocation5] sm:$0xff]  ;;  %v223_v1 = vld [vmem:[#allocation5 + $0x8] sm:$0xff]  ;;  %v224_v2 = vld [vmem:[#allocation5 + $0x10] sm:$0xff]  ;;  %s215_s18 = scalar_lea.vmem [#allocation8], %s667_s30  ;;  %s680_s7 = sshll.u32 %s1245_s16, 9 }
  0x6a   : > { %1175 = vsyncadd (%p1490_p8), [#allocation6], 4294961024  ;;  %v855_v3 = vpack.c.bf16 %v223_v1, %v222_v0  ;;  %v225_v4 = vld [vmem:[#allocation5 + $0x18] sm:$0xff]  ;;  %v226_v6 = vld [vmem:[#allocation5 + $0x20] sm:$0xff]  ;;  %s566_s20 = sshll.u32 %s215_s18, 4  ;;  %s1430_s27 = scalar_lea.hbm %s1477_s3, %s680_s7  ;;  %s1425_s20 = int_to_ptr.vmem [resolvable:$true] %s566_s20 }
  0x6b   : > { %v859_v5 = vpack.c.bf16 %v225_v4, %v224_v2  ;;  %v227_v7 = vld [vmem:[#allocation5 + $0x28] sm:$0xff]  ;;  %v218_v9 = vld [vmem:[%s1408_s28] sm:$0xff]  ;;  %v228_v10 = vld [vmem:[#allocation5 + $0x30] sm:$0xff]  ;;  %s553_s22 = scalar_lea.sflag [#allocation4], %s1402_s29  ;;  %s1124_s16 = scalar_lea.vmem %s1425_s20, 512 }
  0x6c   : > { %856 = vmatprep.subr.bf16.mxu0 %v855_v3  ;;  %v863_v8 = vpack.c.bf16 %v227_v7, %v226_v6  ;;  %v229_v11 = vld [vmem:[#allocation5 + $0x38] sm:$0xff]  ;;  %773 = vmatprep.mubr.f32.mxu0 %v218_v9  ;;  %v332_v12 = vld [vmem:[#allocation5 + $0x80] sm:$0xff]  ;;  %v333_v13 = vld [vmem:[#allocation5 + $0x88] sm:$0xff]  ;;  %p1125_p11 = scmp.ne.s32.totalorder %s1425_s20, %s1124_s16  ;;  %p1491_p0 = scmp.ne.s32.totalorder %s1486_s6, 0 }
  0x6d   : > { %858 = vmatpush3.bf16.msra.mxu0 %v855_v3  ;;  %v334_v14 = vld [vmem:[#allocation5 + $0x90] sm:$0xff]  ;;  %v335_v15 = vld [vmem:[#allocation5 + $0x98] sm:$0xff]  ;;  %v887_v16 = vpack.c.bf16 %v333_v13, %v332_v12  ;;  %v867_v18 = vpack.c.bf16 %v229_v11, %v228_v10  ;;  %v336_v19 = vld [vmem:[#allocation5 + $0xa0] sm:$0xff]  ;;  %s1201_s5 = smov [#allocation8]  }
  0x6e   : > { %860 = vmatprep.subr.bf16.mxu0 %v859_v5  ;;  %v891_v17 = vpack.c.bf16 %v335_v15, %v334_v14  ;;  %v337_v20 = vld [vmem:[#allocation5 + $0xa8] sm:$0xff]  ;;  %v230_v21 = vld [vmem:[#allocation5 + $0x40] sm:$0xff]  ;;  %v338_v25 = vld [vmem:[#allocation5 + $0xb0] sm:$0xff]  ;;  %p1126_p2 = pnand %p1125_p11, %p1491_p0  ;;  %s1128_s11 = sshll.u32 %s1201_s5, 4  ;;  %s1129_s11 = int_to_ptr.vmem [resolvable:$false] %s1128_s11 }
  0x6f   : > { %v231_v22 = vld [vmem:[#allocation5 + $0x48] sm:$0xff]  ;;  %888 = vmatprep.subr.bf16.mxu1 %v887_v16  ;;  %v895_v23 = vpack.c.bf16 %v337_v20, %v336_v19  ;;  %v339_v26 = vld [vmem:[#allocation5 + $0xb8] sm:$0xff]  ;;  %v232_v27 = vld [vmem:[#allocation5 + $0x50] sm:$0xff]  ;;  %s1130_s25 = scalar_lea.vmem %s1129_s11, 1024  ;;  %p1131_p7 = scmp.lt.s32.totalorder %s1425_s20, %s1129_s11 }
  0x70   : > { %890 = vmatpush3.bf16.msra.mxu1 %v887_v16  ;;  %v871_v24 = vpack.c.bf16 %v231_v22, %v230_v21  ;;  %v233_v28 = vld [vmem:[#allocation5 + $0x58] sm:$0xff]  ;;  %v899_v29 = vpack.c.bf16 %v339_v26, %v338_v25  ;;  %v340_v31 = vld [vmem:[#allocation5 + $0xc0] sm:$0xff]  ;;  %v341_v32 = vld [vmem:[#allocation5 + $0xc8] sm:$0xff]  ;;  %p1127_p3 = pneg %p1126_p2  ;;  %p1132_p9 = scmp.lt.s32.totalorder %s1130_s25, %s1124_s16 }
  0x71   : > { %862 = vmatpush3.bf16.msra.mxu0 %v859_v5  ;;  %892 = vmatprep.subr.bf16.mxu1 %v891_v17  ;;  %v875_v30 = vpack.c.bf16 %v233_v28, %v232_v27  ;;  %v234_v33 = vld [vmem:[#allocation5 + $0x60] sm:$0xff]  ;;  %v235_v34 = vld [vmem:[#allocation5 + $0x68] sm:$0xff]  ;;  %v903_v35 = vpack.c.bf16 %v341_v32, %v340_v31  ;;  %v342_v37 = vld [vmem:[#allocation5 + $0xd0] sm:$0xff] }
  0x72   : > { %864 = vmatprep.subr.bf16.mxu0 %v863_v8  ;;  %v879_v36 = vpack.c.bf16 %v235_v34, %v234_v33  ;;  %v343_v38 = vld [vmem:[#allocation5 + $0xd8] sm:$0xff]  ;;  %v236_v39 = vld [vmem:[#allocation5 + $0x70] sm:$0xff]  ;;  %v344_v43 = vld [vmem:[#allocation5 + $0xe0] sm:$0xff]  ;;  %p1133_p12 = por %p1132_p9, %p1131_p7 }
  0x73   : > { %v237_v40 = vld [vmem:[#allocation5 + $0x78] sm:$0xff]  ;;  %v907_v41 = vpack.c.bf16 %v343_v38, %v342_v37  ;;  %v345_v44 = vld [vmem:[#allocation5 + $0xe8] sm:$0xff]  ;;  %v220_v47 = vld [vmem:[%s1408_s28 + $0x10] sm:$0xff] }
  0x74   : > { %894 = vmatpush3.bf16.msra.mxu1 %v891_v17  ;;  %v883_v42 = vpack.c.bf16 %v237_v40, %v236_v39  ;;  %v911_v45 = vpack.c.bf16 %v345_v44, %v344_v43  ;;  %v219_v46 = vld [vmem:[%s1408_s28 + $0x8] sm:$0xff]  ;;  %v221_v48 = vld [vmem:[%s1408_s28 + $0x18] sm:$0xff]  ;;  %v346_v49 = vld [vmem:[#allocation5 + $0xf0] sm:$0xff]  ;;  %p1134_p1 = pnand %p1133_p12, %p1127_p3 }
  0x75   : > { %866 = vmatpush3.bf16.msra.mxu0 %v863_v8  ;;  %896 = vmatprep.subr.bf16.mxu1 %v895_v23  ;;  %v347_v50 = vld [vmem:[#allocation5 + $0xf8] sm:$0xff]  ;;  %v442_v52 = vld [vmem:[#allocation5 + $0x100] sm:$0xff]  ;;  %v443_v53 = vld [vmem:[#allocation5 + $0x108] sm:$0xff] }
  0x76   : > { %868 = vmatprep.subr.bf16.mxu0 %v867_v18  ;;  %v915_v51 = vpack.c.bf16 %v347_v50, %v346_v49  ;;  %v444_v54 = vld [vmem:[#allocation5 + $0x110] sm:$0xff]  ;;  %v919_v55 = vpack.c.bf16 %v443_v53, %v442_v52  ;;  %v445_v56 = vld [vmem:[#allocation5 + $0x118] sm:$0xff]  ;;  %v446_v58 = vld [vmem:[#allocation5 + $0x120] sm:$0xff] }
  0x77   : > { %v923_v57 = vpack.c.bf16 %v445_v56, %v444_v54  ;;  %v447_v59 = vld [vmem:[#allocation5 + $0x128] sm:$0xff]  ;;  %v448_v61 = vld [vmem:[#allocation5 + $0x130] sm:$0xff]  ;;  %v449_v62 = vld [vmem:[#allocation5 + $0x138] sm:$0xff] }
  0x78   : > { %898 = vmatpush3.bf16.msra.mxu1 %v895_v23  ;;  %v927_v60 = vpack.c.bf16 %v447_v59, %v446_v58  ;;  %v931_v63 = vpack.c.bf16 %v449_v62, %v448_v61  ;;  %v450_v0 = vld [vmem:[#allocation5 + $0x140] sm:$0xff]  ;;  %v451_v1 = vld [vmem:[#allocation5 + $0x148] sm:$0xff]  ;;  %v452_v3 = vld [vmem:[#allocation5 + $0x150] sm:$0xff] }
  0x79   : > { %870 = vmatpush3.bf16.msra.mxu0 %v867_v18  ;;  %900 = vmatprep.subr.bf16.mxu1 %v899_v29  ;;  %v935_v2 = vpack.c.bf16 %v451_v1, %v450_v0  ;;  %v453_v4 = vld [vmem:[#allocation5 + $0x158] sm:$0xff]  ;;  %v454_v6 = vld [vmem:[#allocation5 + $0x160] sm:$0xff]  ;;  %v455_v7 = vld [vmem:[#allocation5 + $0x168] sm:$0xff] }
  0x7a   : > { %872 = vmatprep.subr.bf16.mxu0 %v871_v24  ;;  %v939_v5 = vpack.c.bf16 %v453_v4, %v452_v3  ;;  %v943_v8 = vpack.c.bf16 %v455_v7, %v454_v6  ;;  %v671_v9 = vld [vmem:[#allocation7] ss:$0 sm:$0xff]  ;;  %v456_v22 = vld [vmem:[#allocation5 + $0x170] sm:$0xff]  ;;  %v457_v23 = vld [vmem:[#allocation5 + $0x178] sm:$0xff] }
  0x7b   : > { %v672_v25 = vld [vmem:[#allocation7 + $0x1] ss:$0 sm:$0xff]  ;;  %v673_v38 = vld [vmem:[#allocation7 + $0x2] ss:$0 sm:$0xff] }
  0x7c   : > { %902 = vmatpush3.bf16.msra.mxu1 %v899_v29 }
  0x7d   : > { %874 = vmatpush3.bf16.msra.mxu0 %v871_v24  ;;  %904 = vmatprep.subr.bf16.mxu1 %v903_v35  ;;  %v947_v24 = vpack.c.bf16 %v457_v23, %v456_v22 }
  0x7e   : > { %876 = vmatprep.subr.bf16.mxu0 %v875_v30 }
  0x80   : > { %906 = vmatpush3.bf16.msra.mxu1 %v903_v35 }
  0x81   : > { %878 = vmatpush3.bf16.msra.mxu0 %v875_v30  ;;  %908 = vmatprep.subr.bf16.mxu1 %v907_v41 }
  0x82   : > { %880 = vmatprep.subr.bf16.mxu0 %v879_v36 }
  0x84   : > { %910 = vmatpush3.bf16.msra.mxu1 %v907_v41 }
  0x85   : > { %882 = vmatpush3.bf16.msra.mxu0 %v879_v36  ;;  %912 = vmatprep.subr.bf16.mxu1 %v911_v45 }
  0x86   : > { %884 = vmatprep.subr.bf16.mxu0 %v883_v42 }
  0x88   : > { %914 = vmatpush3.bf16.msra.mxu1 %v911_v45 }
  0x89   : > { %886 = vmatpush3.bf16.msra.mxu0 %v883_v42  ;;  %916 = vmatprep.subr.bf16.mxu1 %v915_v51 }
  0x8a   : > { %920 = vmatprep.subr.bf16.mxu0 %v919_v55 }
  0x8c   : > { %774 = vmatmul.mubr.f32.vlgmr.msra.gmra.mrb[0].mxu0 %v219_v46  ;;  %918 = vmatpush3.bf16.msra.mxu1 %v915_v51 }
  0x8d   : > { %776 = vmatprep.mubr.f32.mxu0 %v220_v47  ;;  %951 = vmatprep.subr.bf16.mxu1 %v919_v55 }
  0x8e   : > { %922 = vmatpush3.bf16.msra.mxu0 %v919_v55 }
  0x8f   : > { %924 = vmatprep.subr.bf16.mxu0 %v923_v57 }
  0x90   : > { %777 = vmatmul.mubr.f32.gmra.mrb[2].mxu0 %v221_v48 }
  0x92   : > { %926 = vmatpush3.bf16.msra.mxu0 %v923_v57 }
  0x93   : > { %928 = vmatprep.subr.bf16.mxu0 %v927_v60 }
  0x96   : > { %930 = vmatpush3.bf16.msra.mxu0 %v927_v60 }
  0x97   : > { %932 = vmatprep.subr.bf16.mxu0 %v931_v63 }
  0x9a   : > { %934 = vmatpush3.bf16.msra.mxu0 %v931_v63 }
  0x9b   : > { %936 = vmatprep.subr.bf16.mxu0 %v935_v2 }
  0x9e   : > { %938 = vmatpush3.bf16.msra.mxu0 %v935_v2 }
  0x9f   : > { %940 = vmatprep.subr.bf16.mxu0 %v939_v5 }
  0xa2   : > { %942 = vmatpush3.bf16.msra.mxu0 %v939_v5 }
  0xa3   : > { %944 = vmatprep.subr.bf16.mxu0 %v943_v8 }
  0xa6   : > { %946 = vmatpush3.bf16.msra.mxu0 %v943_v8 }
  0xa7   : > { %948 = vmatprep.subr.bf16.mxu0 %v947_v24 }
  0xaa   : > { %950 = vmatpush3.bf16.msra.mxu0 %v947_v24 }
 0x15f   : > { %v775_v10 = vpop.f32.mrb[0].mxu0 }
 0x160   : > { %v315_v11 = vadd.f32 %v775_v10, %v671_v9  ;;  %v309_v12 = vpop.f32.mrb[1].mxu0 }
 0x161   : > { %v310_v13 = vadd.f32 %v671_v9, %v309_v12 }
 0x162   : > { %v329_v16 = vmax.f32 %v315_v11, 0.0 }
 0x163   : > { %v778_v14 = vpop.f32.mrb[2].mxu0  ;;  %v328_v15 = vmax.f32 %v310_v13, 0.0 }
 0x164   : > { %v325_v17 = vadd.f32 %v778_v14, %v671_v9  ;;  %v319_v18 = vpop.f32.mrb[3].mxu0 }
 0x165   : > { %v320_v19 = vadd.f32 %v671_v9, %v319_v18  ;;  %811 = vmatprep.mubr.f32.mxu1 %v328_v15 }
 0x166   : > { %812 = vmatmul.mubr.f32.vlgmr.msra.gmra.mrb[0].mxu1 %v329_v16  ;;  %v331_v21 = vmax.f32 %v325_v17, 0.0 }
 0x167   : > { %v330_v20 = vmax.f32 %v320_v19, 0.0  ;;  %959 = vmatpush3.bf16.msra.mxu1 %v919_v55 }
 0x168   : > { %952 = vmatprep.subr.bf16.mxu1 %v923_v57 }
 0x169   : > { %814 = vmatprep.mubr.f32.mxu1 %v330_v20 }
 0x16a   : > { %815 = vmatmul.mubr.f32.gmra.mrb[2].mxu1 %v331_v21 }
 0x16b   : > { %960 = vmatpush3.bf16.msra.mxu1 %v923_v57 }
 0x16c   : > { %953 = vmatprep.subr.bf16.mxu1 %v927_v60 }
 0x16f   : > { %961 = vmatpush3.bf16.msra.mxu1 %v927_v60 }
 0x170   : > { %954 = vmatprep.subr.bf16.mxu1 %v931_v63 }
 0x173   : > { %962 = vmatpush3.bf16.msra.mxu1 %v931_v63 }
 0x174   : > { %955 = vmatprep.subr.bf16.mxu1 %v935_v2 }
 0x177   : > { %963 = vmatpush3.bf16.msra.mxu1 %v935_v2 }
 0x178   : > { %956 = vmatprep.subr.bf16.mxu1 %v939_v5 }
 0x17b   : > { %964 = vmatpush3.bf16.msra.mxu1 %v939_v5 }
 0x17c   : > { %957 = vmatprep.subr.bf16.mxu1 %v943_v8 }
 0x17f   : > { %965 = vmatpush3.bf16.msra.mxu1 %v943_v8 }
 0x180   : > { %958 = vmatprep.subr.bf16.mxu1 %v947_v24 }
 0x183   : > { %966 = vmatpush3.bf16.msra.mxu1 %v947_v24 }
 0x239   : > { %v813_v26 = vpop.f32.mrb[0].mxu1 }
 0x23a   : > { %v425_v27 = vadd.f32 %v813_v26, %v672_v25  ;;  %v419_v28 = vpop.f32.mrb[1].mxu1 }
 0x23b   : > { %v420_v29 = vadd.f32 %v672_v25, %v419_v28 }
 0x23c   : > { %v439_v32 = vmax.f32 %v425_v27, 0.0 }
 0x23d   : > { %v438_v30 = vmax.f32 %v420_v29, 0.0  ;;  %v816_v31 = vpop.f32.mrb[2].mxu1 }
 0x23e   : > { %v435_v33 = vadd.f32 %v816_v31, %v672_v25  ;;  %v429_v34 = vpop.f32.mrb[3].mxu1 }
 0x23f   : > { %v430_v35 = vadd.f32 %v672_v25, %v429_v34  ;;  %849 = vmatprep.mubr.f32.mxu0 %v438_v30 }
 0x240   : > { %850 = vmatmul.mubr.f32.vlgmr.msra.gmra.mrb[4].mxu0 %v439_v32  ;;  %v441_v37 = vmax.f32 %v435_v33, 0.0 }
 0x241   : > { %v440_v36 = vmax.f32 %v430_v35, 0.0 }
 0x243   : > { %852 = vmatprep.mubr.f32.mxu1 %v440_v36 }
 0x244   : > { %853 = vmatmul.mubr.f32.vlgmr.msra.gmra.mrb[4].mxu1 %v441_v37 }
 0x313   : > { %v851_v39 = vpop.f32.mrb[4].mxu0 }
 0x314   : > { %v535_v40 = vadd.f32 %v851_v39, %v673_v38  ;;  %v529_v41 = vpop.f32.mrb[5].mxu0 }
 0x315   : > { %v530_v42 = vadd.f32 %v673_v38, %v529_v41 }
 0x316   : > { %549 = vst [vmem:[%s215_s18 + $0x8] sm:$0xff] %v535_v40 }
 0x317   : > { %548 = vst [vmem:[%s215_s18] sm:$0xff] %v530_v42  ;;  %v854_v43 = vpop.f32.mrb[4].mxu1 }
 0x318   : > { %v545_v44 = vadd.f32 %v854_v43, %v673_v38  ;;  %v539_v45 = vpop.f32.mrb[5].mxu1 }
 0x319   : > { %v540_v46 = vadd.f32 %v673_v38, %v539_v45 }
 0x31a   : > { %551 = vst [vmem:[%s215_s18 + $0x18] sm:$0xff] %v545_v44 }
 0x31b   : > { %550 = vst [vmem:[%s215_s18 + $0x10] sm:$0xff] %v540_v46 }
 0x31c   : > { %1137 = shalt.err (!%p1134_p1)
}
 0x31d   : > { %s1138_s10 = scalar_lea.hbm %s1430_s27, 512  ;;  %s1142_s26 = scalar_lea.hbm %s1477_s3, 1024 }
 0x31e   : > { %p1139_p13 = scmp.ne.s32.totalorder %s1430_s27, %s1138_s10  ;;  %p1143_p4 = scmp.lt.u32.totalorder %s1430_s27, %s1477_s3 }
 0x31f   : > { %p1144_p5 = scmp.lt.u32.totalorder %s1142_s26, %s1138_s10  ;;  %p1146_p11 = scmp.lt.u32.totalorder %s1138_s10, %s1430_s27 }
 0x320   : > { %p1140_p6 = pnand %p1139_p13, %p1491_p0 }
 0x321   : > { %p1145_p8 = por %p1144_p5, %p1143_p4 }
 0x322   : > { %p1141_p10 = pneg %p1140_p6 }
 0x323   : > { %p1147_p2 = por %p1146_p11, %p1145_p8 }
 0x325   : > { %p1148_p3 = pnand %p1147_p2, %p1141_p10 }
 0x327   : > { %1151 = shalt.err (!%p1148_p3)
}
 0x328   : > { %s1202_s28 = smov 128   ;;  %s1203_s18 = smov 8  }
 0x329   : > { %977 = dma.vmem_to_hbm [thread:$0]  (%p1491_p0), %s1425_s20, 512, %s1430_s27, %s553_s22, %s1202_s28, %s1202_s28, %s1203_s18  }
 0x32a PF: > { %s581_s7 = sand.u32 1, %s1182_s12   ;;  %p1492_p7 = scmp.ne.s32.totalorder %s1482_s19, 0 }
 0x32b   : > { %p1493_p9 = scmp.ge.s32.totalorder %s1194_s15, 2  ;;  %s582_s8 = scalar_lea.sflag [#allocation4], %s581_s7 }
 0x32d   : > { %p991_p12 = pnand %p1493_p9, %p1492_p7 }
 0x32f   : > { %1177 = dma.done.wait (!%p991_p12), %s582_s8, 512  }
 0x330   : > { %1179 = vsyncadd (!%p991_p12), %s582_s8, 4294966784  ;;  %p17_p1 = scmp.ge.s32.totalorder %s1337_s4, 4   ;;  %s1494_s12 = smov %s1186_s13 }
 0x331   : > { %s1495_s13 = smov %s1190_s14  ;;  %s1496_s14 = smov %s1353_s9 }
 0x332   : > { %s1497_s15 = smov %s1337_s4  ;;  %19 = sbr.rel (!%p17_p1) target bundleno = 6 (0x6), region = 85 }
 0x339   :  { %587 = vsyncpa [#allocation3], 1 }
 0x33a   :  { %589 = vsyncpa [#allocation3 + $0x1], 1 }
 0x33b   :  { %590 = vsyncpa [#allocation6], 1 }
 0x33c   :  { %591 = vsyncpa [#allocation4], 1 }
 0x33d   :  { %593 = vsyncpa [#allocation4 + $0x1], 1 }

</bundles_post_ra>
